<compile_context>
chip_gen: v5e
topology: v5e:2x2
jax: 0.10.0
libtpu: 0.0.40
codegen_flags: <defaults>
</compile_context>

<pallas_src>
import functools

import jax
import jax.numpy as jnp
from jax.experimental import pallas as pl
from jax.experimental.pallas import tpu as pltpu


def _add_one_kernel(x_ref, o_ref):
    # Elementwise hot path on the VPU for the current VMEM tile.
    o_ref[...] = x_ref[...] + jnp.asarray(1, dtype=o_ref.dtype)


def _pick_cols(total: int, preferred: int):
    """Pick a lane-dense width that divides `total` exactly (no padding).

    Returns (ncols, needs_padding).
    """
    candidates = (preferred, 1024, 512, 2048, 256, 4096, 128)
    for c in candidates:
        if c % 128 == 0 and total % c == 0:
            return c, False
    # Awkward total: fall back to padding up to a multiple of `preferred`.
    return preferred, True


def _add_one_impl(x: jax.Array, *, tile_rows: int = 512, tile_cols: int = 1024,
                  donate_input: bool = False) -> jax.Array:
    orig_shape = x.shape
    orig_dtype = x.dtype

    total = 1
    for d in orig_shape:
        total *= d
    if total == 0:
        return x  # nothing to do

    itemsize = jnp.dtype(orig_dtype).itemsize
    # Minimum sublane multiple for packed sub-32-bit dtypes (f32:8, bf16:16, int8:32).
    sub = max(8, 32 // max(itemsize, 1))
    assert tile_cols % 128 == 0, "tile_cols must be a multiple of 128 (lane width)"
    assert tile_rows % sub == 0, f"tile_rows must be a multiple of {sub} for {orig_dtype}"

    ncols, needs_pad = _pick_cols(total, tile_cols)
    nrows = pl.cdiv(total, ncols)

    # Flatten; reshape is metadata-only under jit when no padding is required.
    x_flat = jnp.ravel(x)
    if needs_pad:
        padded_total = nrows * ncols
        x_flat = jnp.pad(x_flat, (0, padded_total - total))
    x2d = x_flat.reshape(nrows, ncols)

    # Choose the per-block row count.
    if nrows > tile_rows:
        block_rows = tile_rows                       # multiple of `sub`; edge block is partial
    elif nrows >= 2 * sub and nrows * ncols * itemsize >= (1 << 20):
        # Medium single-block input: split in two so both v7x TensorCores get work.
        block_rows = ((pl.cdiv(nrows, 2) + sub - 1) // sub) * sub
    else:
        block_rows = nrows                           # full-dim block (always legal)

    grid_rows = pl.cdiv(nrows, block_rows)

    # Aliasing is free when the kernel input is a fresh temp (padding path);
    # otherwise only alias if the caller explicitly opted in (donated input).
    alias = {0: 0} if (needs_pad or donate_input) else {}

    out2d = pl.pallas_call(
        _add_one_kernel,
        out_shape=jax.ShapeDtypeStruct((nrows, ncols), orig_dtype),
        grid_spec=pltpu.PrefetchScalarGridSpec(
            num_scalar_prefetch=0,
            grid=(grid_rows,),
            in_specs=[pl.BlockSpec((block_rows, ncols), lambda i: (i, 0))],
            out_specs=pl.BlockSpec((block_rows, ncols), lambda i: (i, 0)),
        ),
        compiler_params=pltpu.CompilerParams(
            dimension_semantics=("parallel",),
        ),
        input_output_aliases=alias,
    )(x2d)

    if needs_pad:
        return out2d.reshape(-1)[:total].reshape(orig_shape)
    return out2d.reshape(orig_shape)


# Jit the whole wrapper so reshapes are metadata-only and dispatch is fused.
add_one = jax.jit(
    functools.partial(_add_one_impl),
    static_argnames=("tile_rows", "tile_cols", "donate_input"),
)


if __name__ == "__main__":
    key = jax.random.PRNGKey(0)
    # Small shape consistent with a generic NCHW tensor input.
    x = jax.random.normal(key, (2, 4, 16, 16), dtype=jnp.float32)

    y = add_one(x)
    y = jax.block_until_ready(y)

    # Correctness check against plain JAX reference.
    ref = x + 1
    assert y.shape == x.shape and y.dtype == x.dtype
    assert jnp.allclose(y, ref), "mismatch vs reference"

    # Also exercise a larger, multi-block (and TC-splitting) path.
    x_big = jax.random.normal(key, (8, 64, 64, 64), dtype=jnp.float32)
    y_big = jax.block_until_ready(add_one(x_big))
    assert jnp.allclose(y_big, x_big + 1), "mismatch vs reference (large)"

    print("KERNEL_OK")
</pallas_src>

<mosaic_0001>
module attributes {stable_mosaic.version = 11 : i64} {
  func.func @_add_one_kernel(%arg0: i32, %arg1: memref<2x1024xf32, #tpu.memory_space<vmem>>, %arg2: memref<2x1024xf32, #tpu.memory_space<vmem>>) attributes {dimension_semantics = [#tpu.dimension_semantics<parallel>], iteration_bounds = array<i64: 1>, scalar_prefetch = 0 : i64, scratch_operands = 0 : i64, tpu.core_type = #tpu.core_type<tc>, window_params = [{transform_indices = @transform_0, window_bounds = array<i64: 2, 1024>}, {transform_indices = @transform_1, window_bounds = array<i64: 2, 1024>}]} {
    %c0 = arith.constant 0 : index
    %c0_0 = arith.constant 0 : index
    %0 = vector.load %arg1[%c0, %c0_0] : memref<2x1024xf32, #tpu.memory_space<vmem>>, vector<2x1024xf32>
    %cst = arith.constant 1.000000e+00 : f32
    %1 = vector.broadcast %cst : f32 to vector<2x1024xf32>
    %2 = arith.addf %0, %1 : vector<2x1024xf32>
    %c0_1 = arith.constant 0 : index
    %c0_2 = arith.constant 0 : index
    %3 = vector.load %arg2[%c0_1, %c0_2] : memref<2x1024xf32, #tpu.memory_space<vmem>>, vector<2x1024xf32>
    tpu.vector_store %arg2[%c0_1, %c0_2], %2 {strides = array<i32>} : memref<2x1024xf32, #tpu.memory_space<vmem>>, vector<2x1024xf32>,
    return
  }
  func.func @transform_0(%arg0: i32) -> (i32, i32) {
    %c0_i32 = arith.constant 0 : i32
    %c0_i32_0 = arith.constant 0 : i32
    return %arg0, %c0_i32 : i32, i32
  }
  func.func @transform_1(%arg0: i32) -> (i32, i32) {
    %c0_i32 = arith.constant 0 : i32
    %c0_i32_0 = arith.constant 0 : i32
    return %arg0, %c0_i32 : i32, i32
  }
}

</mosaic_0001>

<bundles_post_ra>
// kernel: _add_one_impl.1
= control target key start
LH: loop header
LB: loop body
LE: loop exit
PB: predicated region body
PF: predicated region fallthrough
CT: control target
= control target key end

     0   :  { %s40_s0 = inlined_call_operand.vmem [shape: f32[2,1024], index: 0, kind: input, shape index: {}]   ;;  %s41_s1 = inlined_call_operand.vmem [shape: f32[2,1024], index: 1, kind: output, shape index: {}]  }
   0x1   :  { %v8_v0 = vld [vmem:[%s40_s0] sm:$0xff]  ;;  %v9_v1 = vld [vmem:[%s40_s0 + $0x8] sm:$0xff] }
   0x2   :  { %v10_v2 = vadd.f32 1.0, %v8_v0  ;;  %v11_v3 = vadd.f32 1.0, %v9_v1 }
   0x4   :  { %12 = vst [vmem:[%s41_s1] sm:$0xff] %v10_v2 }
   0x5   :  { %13 = vst [vmem:[%s41_s1 + $0x8] sm:$0xff] %v11_v3 }

</bundles_post_ra>
